<compile_context>
chip_gen: v7x
topology: tpu7x:2x2x1
jax: 0.10.0
libtpu: 0.0.40
codegen_flags: <defaults>
</compile_context>

<pallas_src>
import functools

import jax
import jax.numpy as jnp
from jax.experimental import pallas as pl
from jax.experimental.pallas import tpu as pltpu

LANE = 128
SUBLANE = 8
TILE_B_MAX = 512


def _round_up(n, m):
    return ((n + m - 1) // m) * m


def mlp_kernel(x_ref, w1_ref, b1_ref, w2_ref, b2_ref, w3_ref, b3_ref, o_ref):
    # Feature dims are pre-padded to multiples of 128, so all dots and the
    # final store are lane-dense. Accumulate in f32 on the MXU; biases stay f32.
    h1 = jnp.dot(x_ref[...], w1_ref[...], preferred_element_type=jnp.float32)
    h1 = jnp.maximum(h1 + b1_ref[...], 0.0).astype(w2_ref.dtype)
    h2 = jnp.dot(h1, w2_ref[...], preferred_element_type=jnp.float32)
    h2 = jnp.maximum(h2 + b2_ref[...], 0.0).astype(w3_ref.dtype)
    out = jnp.dot(h2, w3_ref[...], preferred_element_type=jnp.float32)
    o_ref[...] = (out + b3_ref[...]).astype(o_ref.dtype)


def _pad2(a, rows, cols):
    r, c = a.shape
    return jnp.pad(a, ((0, rows - r), (0, cols - c)))


@functools.partial(jax.jit, static_argnames=("compute_dtype",))
def simple_mlp(x, w1, b1, w2, b2, w3, b3, compute_dtype=jnp.float32):
    """x: [B, D_in]; w_i: [in, out] (pre-transposed); b_i: [1, out]. Returns [B, out_dim]."""
    B, d_in = x.shape
    h1, h2, d_out = w1.shape[1], w2.shape[1], w3.shape[1]

    # Lane-dense padding of all feature dims (zeros -> exact result after slicing).
    d_in_p = _round_up(d_in, LANE)
    h1_p = _round_up(h1, LANE)
    h2_p = _round_up(h2, LANE)
    d_out_p = _round_up(d_out, LANE)

    # Batch tiling: weights VMEM-resident, activations streamed per grid step.
    tile_b = min(TILE_B_MAX, _round_up(B, SUBLANE))
    b_pad = _round_up(B, tile_b)
    grid = (b_pad // tile_b,)

    xp = _pad2(x, b_pad, d_in_p).astype(compute_dtype)
    w1p = _pad2(w1, d_in_p, h1_p).astype(compute_dtype)
    w2p = _pad2(w2, h1_p, h2_p).astype(compute_dtype)
    w3p = _pad2(w3, h2_p, d_out_p).astype(compute_dtype)
    b1p = _pad2(b1, 1, h1_p)   # biases stay f32 (added to the f32 accumulator)
    b2p = _pad2(b2, 1, h2_p)
    b3p = _pad2(b3, 1, d_out_p)

    const = lambda i: (0, 0)   # weights/biases: same block every step -> VMEM-resident
    out_padded = pl.pallas_call(
        mlp_kernel,
        out_shape=jax.ShapeDtypeStruct((b_pad, d_out_p), jnp.float32),
        grid=grid,
        in_specs=[
            pl.BlockSpec((tile_b, d_in_p), lambda i: (i, 0)),   # x tile streams over batch
            pl.BlockSpec((d_in_p, h1_p), const),
            pl.BlockSpec((1, h1_p), const),
            pl.BlockSpec((h1_p, h2_p), const),
            pl.BlockSpec((1, h2_p), const),
            pl.BlockSpec((h2_p, d_out_p), const),
            pl.BlockSpec((1, d_out_p), const),
        ],
        out_specs=pl.BlockSpec((tile_b, d_out_p), lambda i: (i, 0)),
        compiler_params=pltpu.CompilerParams(
            dimension_semantics=("parallel",),   # shards batch axis across v7x's 2 TCs
        ),
    )(xp, w1p, b1p, w2p, b2p, w3p, b3p)

    return out_padded[:B, :d_out]


def init_linear(key, in_features, out_features):
    """PyTorch-style uniform(-1/sqrt(in), 1/sqrt(in)) init.
    Weight returned pre-transposed to [in_features, out_features], bias [1, out]."""
    kw, kb = jax.random.split(key)
    bound = 1.0 / jnp.sqrt(jnp.float32(in_features))
    w = jax.random.uniform(kw, (in_features, out_features), jnp.float32, -bound, bound)
    b = jax.random.uniform(kb, (1, out_features), jnp.float32, -bound, bound)
    return w, b


def _ref_mlp(x, w1, b1, w2, b2, w3, b3):
    h = jnp.maximum(x @ w1 + b1, 0.0)
    h = jnp.maximum(h @ w2 + b2, 0.0)
    return h @ w3 + b3


if __name__ == "__main__":
    encoder_input_dim, hidden_dim1, hidden_dim2, output_dim = 368, 194, 97, 11
    batch = 8

    key = jax.random.PRNGKey(0)
    kx, k1, k2, k3 = jax.random.split(key, 4)

    x = jax.random.normal(kx, (batch, encoder_input_dim), jnp.float32)
    w1, b1 = init_linear(k1, encoder_input_dim, hidden_dim1)
    w2, b2 = init_linear(k2, hidden_dim1, hidden_dim2)
    w3, b3 = init_linear(k3, hidden_dim2, output_dim)

    out = simple_mlp(x, w1, b1, w2, b2, w3, b3)
    jax.block_until_ready(out)

    ref = _ref_mlp(x, w1, b1, w2, b2, w3, b3)
    assert out.shape == (batch, output_dim)
    assert jnp.allclose(out, ref, atol=1e-4, rtol=1e-4)

    # Also exercise a multi-tile grid (batch > TILE_B, non-multiple) to
    # validate the batch-streaming pipeline and padding/slicing path.
    xb = jax.random.normal(kx, (1031, encoder_input_dim), jnp.float32)
    outb = simple_mlp(xb, w1, b1, w2, b2, w3, b3)
    jax.block_until_ready(outb)
    refb = _ref_mlp(xb, w1, b1, w2, b2, w3, b3)
    assert outb.shape == (1031, output_dim)
    assert jnp.allclose(outb, refb, atol=1e-4, rtol=1e-4)

    print("KERNEL_OK")
</pallas_src>

<mosaic_0001>
module attributes {stable_mosaic.version = 11 : i64} {
  func.func @mlp_kernel(%arg0: i32, %arg1: memref<8x384xf32, #tpu.memory_space<vmem>>, %arg2: memref<384x256xf32, #tpu.memory_space<vmem>>, %arg3: memref<1x256xf32, #tpu.memory_space<vmem>>, %arg4: memref<256x128xf32, #tpu.memory_space<vmem>>, %arg5: memref<1x128xf32, #tpu.memory_space<vmem>>, %arg6: memref<128x128xf32, #tpu.memory_space<vmem>>, %arg7: memref<1x128xf32, #tpu.memory_space<vmem>>, %arg8: memref<8x128xf32, #tpu.memory_space<vmem>>) attributes {dimension_semantics = [#tpu.dimension_semantics<parallel>], iteration_bounds = array<i64: 1>, scalar_prefetch = 0 : i64, scratch_operands = 0 : i64, tpu.core_type = #tpu.core_type<tc>, window_params = [{transform_indices = @transform_0, window_bounds = array<i64: 8, 384>}, {pipeline_mode = #tpu.pipeline_mode<synchronous>, transform_indices = @transform_1, window_bounds = array<i64: 384, 256>}, {pipeline_mode = #tpu.pipeline_mode<synchronous>, transform_indices = @transform_2, window_bounds = array<i64: 1, 256>}, {pipeline_mode = #tpu.pipeline_mode<synchronous>, transform_indices = @transform_3, window_bounds = array<i64: 256, 128>}, {pipeline_mode = #tpu.pipeline_mode<synchronous>, transform_indices = @transform_4, window_bounds = array<i64: 1, 128>}, {pipeline_mode = #tpu.pipeline_mode<synchronous>, transform_indices = @transform_5, window_bounds = array<i64: 128, 128>}, {pipeline_mode = #tpu.pipeline_mode<synchronous>, transform_indices = @transform_6, window_bounds = array<i64: 1, 128>}, {transform_indices = @transform_7, window_bounds = array<i64: 8, 128>}]} {
    %c0 = arith.constant 0 : index
    %c0_0 = arith.constant 0 : index
    %0 = vector.load %arg1[%c0, %c0_0] : memref<8x384xf32, #tpu.memory_space<vmem>>, vector<8x384xf32>
    %c0_1 = arith.constant 0 : index
    %c0_2 = arith.constant 0 : index
    %1 = vector.load %arg2[%c0_1, %c0_2] : memref<384x256xf32, #tpu.memory_space<vmem>>, vector<384x256xf32>
    %cst = arith.constant dense<0.000000e+00> : vector<8x256xf32>
    %2 = tpu.matmul %0, %1, %cst {dimension_numbers = #tpu.dot_dimension_numbers<[1], [0], [0], [1], [0, 0, 1, 1], [], []>} : vector<8x384xf32>, vector<384x256xf32>, vector<8x256xf32> -> vector<8x256xf32>
    %c0_3 = arith.constant 0 : index
    %c0_4 = arith.constant 0 : index
    %3 = vector.load %arg3[%c0_3, %c0_4] : memref<1x256xf32, #tpu.memory_space<vmem>>, vector<1x256xf32>
    %4 = vector.broadcast %3 : vector<1x256xf32> to vector<8x256xf32>
    %5 = arith.addf %2, %4 : vector<8x256xf32>
    %cst_5 = arith.constant 0.000000e+00 : f32
    %6 = vector.broadcast %cst_5 : f32 to vector<8x256xf32>
    %7 = arith.maximumf %5, %6 : vector<8x256xf32>
    %c0_6 = arith.constant 0 : index
    %c0_7 = arith.constant 0 : index
    %8 = vector.load %arg4[%c0_6, %c0_7] : memref<256x128xf32, #tpu.memory_space<vmem>>, vector<256x128xf32>
    %cst_8 = arith.constant dense<0.000000e+00> : vector<8x128xf32>
    %9 = tpu.matmul %7, %8, %cst_8 {dimension_numbers = #tpu.dot_dimension_numbers<[1], [0], [0], [1], [0, 0, 1, 1], [], []>} : vector<8x256xf32>, vector<256x128xf32>, vector<8x128xf32> -> vector<8x128xf32>
    %c0_9 = arith.constant 0 : index
    %c0_10 = arith.constant 0 : index
    %10 = vector.load %arg5[%c0_9, %c0_10] : memref<1x128xf32, #tpu.memory_space<vmem>>, vector<1x128xf32>
    %11 = vector.broadcast %10 : vector<1x128xf32> to vector<8x128xf32>
    %12 = arith.addf %9, %11 : vector<8x128xf32>
    %cst_11 = arith.constant 0.000000e+00 : f32
    %13 = vector.broadcast %cst_11 : f32 to vector<8x128xf32>
    %14 = arith.maximumf %12, %13 : vector<8x128xf32>
    %c0_12 = arith.constant 0 : index
    %c0_13 = arith.constant 0 : index
    %15 = vector.load %arg6[%c0_12, %c0_13] : memref<128x128xf32, #tpu.memory_space<vmem>>, vector<128x128xf32>
    %cst_14 = arith.constant dense<0.000000e+00> : vector<8x128xf32>
    %16 = tpu.matmul %14, %15, %cst_14 {dimension_numbers = #tpu.dot_dimension_numbers<[1], [0], [0], [1], [0, 0, 1, 1], [], []>} : vector<8x128xf32>, vector<128x128xf32>, vector<8x128xf32> -> vector<8x128xf32>
    %c0_15 = arith.constant 0 : index
    %c0_16 = arith.constant 0 : index
    %17 = vector.load %arg7[%c0_15, %c0_16] : memref<1x128xf32, #tpu.memory_space<vmem>>, vector<1x128xf32>
    %18 = vector.broadcast %17 : vector<1x128xf32> to vector<8x128xf32>
    %19 = arith.addf %16, %18 : vector<8x128xf32>
    %c0_17 = arith.constant 0 : index
    %c0_18 = arith.constant 0 : index
    %20 = vector.load %arg8[%c0_17, %c0_18] : memref<8x128xf32, #tpu.memory_space<vmem>>, vector<8x128xf32>
    tpu.vector_store %arg8[%c0_17, %c0_18], %19 {strides = array<i32>} : memref<8x128xf32, #tpu.memory_space<vmem>>, vector<8x128xf32>,
    return
  }
  func.func @transform_0(%arg0: i32) -> (i32, i32) {
    %c0_i32 = arith.constant 0 : i32
    %c0_i32_0 = arith.constant 0 : i32
    return %arg0, %c0_i32 : i32, i32
  }
  func.func @transform_1(%arg0: i32) -> (i32, i32) {
    %c0_i32 = arith.constant 0 : i32
    %c0_i32_0 = arith.constant 0 : i32
    %c0_i32_1 = arith.constant 0 : i32
    return %c0_i32, %c0_i32_0 : i32, i32
  }
  func.func @transform_2(%arg0: i32) -> (i32, i32) {
    %c0_i32 = arith.constant 0 : i32
    %c0_i32_0 = arith.constant 0 : i32
    %c0_i32_1 = arith.constant 0 : i32
    return %c0_i32, %c0_i32_0 : i32, i32
  }
  func.func @transform_3(%arg0: i32) -> (i32, i32) {
    %c0_i32 = arith.constant 0 : i32
    %c0_i32_0 = arith.constant 0 : i32
    %c0_i32_1 = arith.constant 0 : i32
    return %c0_i32, %c0_i32_0 : i32, i32
  }
  func.func @transform_4(%arg0: i32) -> (i32, i32) {
    %c0_i32 = arith.constant 0 : i32
    %c0_i32_0 = arith.constant 0 : i32
    %c0_i32_1 = arith.constant 0 : i32
    return %c0_i32, %c0_i32_0 : i32, i32
  }
  func.func @transform_5(%arg0: i32) -> (i32, i32) {
    %c0_i32 = arith.constant 0 : i32
    %c0_i32_0 = arith.constant 0 : i32
    %c0_i32_1 = arith.constant 0 : i32
    return %c0_i32, %c0_i32_0 : i32, i32
  }
  func.func @transform_6(%arg0: i32) -> (i32, i32) {
    %c0_i32 = arith.constant 0 : i32
    %c0_i32_0 = arith.constant 0 : i32
    %c0_i32_1 = arith.constant 0 : i32
    return %c0_i32, %c0_i32_0 : i32, i32
  }
  func.func @transform_7(%arg0: i32) -> (i32, i32) {
    %c0_i32 = arith.constant 0 : i32
    %c0_i32_0 = arith.constant 0 : i32
    return %arg0, %c0_i32 : i32, i32
  }
}

</mosaic_0001>

<bundles_post_ra>
// kernel: simple_mlp.1
= control target key start
LH: loop header
LB: loop body
LE: loop exit
PB: predicated region body
PF: predicated region fallthrough
CT: control target
= control target key end

     0   :  { %s1281_s0 = inlined_call_operand.vmem [shape: f32[8,384], index: 0, kind: input, shape index: {}]   ;;  %s1282_s1 = inlined_call_operand.vmem [shape: f32[384,256], index: 1, kind: input, shape index: {}]   ;;  %s1283_s2 = inlined_call_operand.vmem [shape: f32[1,256], index: 2, kind: input, shape index: {}]   ;;  %s1284_s3 = inlined_call_operand.vmem [shape: f32[256,128], index: 3, kind: input, shape index: {}]   ;;  %s1285_s4 = inlined_call_operand.vmem [shape: f32[1,128], index: 4, kind: input, shape index: {}]   ;;  %s1286_s5 = inlined_call_operand.vmem [shape: f32[128,128], index: 5, kind: input, shape index: {}]   ;;  %s1287_s6 = inlined_call_operand.vmem [shape: f32[1,128], index: 6, kind: input, shape index: {}]   ;;  %s1288_s7 = inlined_call_operand.hbm [shape: f32[8,128], index: 7, kind: output, shape index: {}]  }
   0x1   :  { %v31_v0 = vld [vmem:[%s1282_s1 + $0x8] sm:$0xff]  ;;  %v33_v1 = vld [vmem:[%s1282_s1 + $0x18] sm:$0xff]  ;;  %v30_v2 = vld [vmem:[%s1282_s1] sm:$0xff] }
   0x2   :  { %v589_v3 = vpack.c.bf16 %v33_v1, %v31_v0  ;;  %v32_v4 = vld [vmem:[%s1282_s1 + $0x10] sm:$0xff]  ;;  %v35_v5 = vld [vmem:[%s1282_s1 + $0x28] sm:$0xff]  ;;  %v37_v6 = vld [vmem:[%s1282_s1 + $0x38] sm:$0xff] }
   0x3   :  { %v591_v7 = vpack.c.bf16 %v32_v4, %v30_v2  ;;  %v593_v8 = vpack.c.bf16 %v37_v6, %v35_v5  ;;  %v34_v9 = vld [vmem:[%s1282_s1 + $0x20] sm:$0xff]  ;;  %v36_v10 = vld [vmem:[%s1282_s1 + $0x30] sm:$0xff]  ;;  %v39_v11 = vld [vmem:[%s1282_s1 + $0x48] sm:$0xff] }
   0x4   :  { %590 = vmatprep.subr.bf16.mxu0 %v589_v3  ;;  %v41_v12 = vld [vmem:[%s1282_s1 + $0x58] sm:$0xff]  ;;  %v595_v13 = vpack.c.bf16 %v36_v10, %v34_v9  ;;  %v38_v15 = vld [vmem:[%s1282_s1 + $0x40] sm:$0xff]  ;;  %v40_v16 = vld [vmem:[%s1282_s1 + $0x50] sm:$0xff] }
   0x5   :  { %592 = vmatpush1.bf16.msra.mxu0 %v591_v7  ;;  %v597_v14 = vpack.c.bf16 %v41_v12, %v39_v11  ;;  %v43_v17 = vld [vmem:[%s1282_s1 + $0x68] sm:$0xff]  ;;  %v45_v18 = vld [vmem:[%s1282_s1 + $0x78] sm:$0xff]  ;;  %v599_v19 = vpack.c.bf16 %v40_v16, %v38_v15  ;;  %v42_v21 = vld [vmem:[%s1282_s1 + $0x60] sm:$0xff] }
   0x6   :  { %594 = vmatprep.subr.bf16.mxu0 %v593_v8  ;;  %v601_v20 = vpack.c.bf16 %v45_v18, %v43_v17  ;;  %v44_v22 = vld [vmem:[%s1282_s1 + $0x70] sm:$0xff]  ;;  %v47_v23 = vld [vmem:[%s1282_s1 + $0x88] sm:$0xff]  ;;  %v49_v24 = vld [vmem:[%s1282_s1 + $0x98] sm:$0xff] }
   0x7   :  { %v603_v25 = vpack.c.bf16 %v44_v22, %v42_v21  ;;  %v605_v26 = vpack.c.bf16 %v49_v24, %v47_v23  ;;  %v46_v27 = vld [vmem:[%s1282_s1 + $0x80] sm:$0xff]  ;;  %v48_v28 = vld [vmem:[%s1282_s1 + $0x90] sm:$0xff]  ;;  %v51_v29 = vld [vmem:[%s1282_s1 + $0xa8] sm:$0xff] }
   0x8   :  { %v53_v30 = vld [vmem:[%s1282_s1 + $0xb8] sm:$0xff]  ;;  %v607_v31 = vpack.c.bf16 %v48_v28, %v46_v27  ;;  %v50_v33 = vld [vmem:[%s1282_s1 + $0xa0] sm:$0xff]  ;;  %v52_v34 = vld [vmem:[%s1282_s1 + $0xb0] sm:$0xff] }
   0x9   :  { %596 = vmatpush1.bf16.msra.mxu0 %v595_v13  ;;  %v609_v32 = vpack.c.bf16 %v53_v30, %v51_v29  ;;  %v55_v35 = vld [vmem:[%s1282_s1 + $0xc8] sm:$0xff]  ;;  %v57_v36 = vld [vmem:[%s1282_s1 + $0xd8] sm:$0xff]  ;;  %v611_v37 = vpack.c.bf16 %v52_v34, %v50_v33  ;;  %v54_v39 = vld [vmem:[%s1282_s1 + $0xc0] sm:$0xff] }
   0xa   :  { %598 = vmatprep.subr.bf16.mxu0 %v597_v14  ;;  %v613_v38 = vpack.c.bf16 %v57_v36, %v55_v35  ;;  %v56_v40 = vld [vmem:[%s1282_s1 + $0xd0] sm:$0xff]  ;;  %v28_v41 = vld [vmem:[%s1281_s0 + $0x8] sm:$0xff]  ;;  %v61_v43 = vld [vmem:[%s1282_s1 + $0xf8] sm:$0xff] }
   0xb   :  { %v59_v42 = vld [vmem:[%s1282_s1 + $0xe8] sm:$0xff]  ;;  %202 = vmatprep.mubr.f32.mxu0 %v28_v41  ;;  %v615_v44 = vpack.c.bf16 %v56_v40, %v54_v39  ;;  %v58_v46 = vld [vmem:[%s1282_s1 + $0xe0] sm:$0xff]  ;;  %v60_v47 = vld [vmem:[%s1282_s1 + $0xf0] sm:$0xff] }
   0xc   :  { %v617_v45 = vpack.c.bf16 %v61_v43, %v59_v42  ;;  %v63_v48 = vld [vmem:[%s1282_s1 + $0x108] sm:$0xff]  ;;  %v65_v49 = vld [vmem:[%s1282_s1 + $0x118] sm:$0xff]  ;;  %v619_v50 = vpack.c.bf16 %v60_v47, %v58_v46  ;;  %v62_v52 = vld [vmem:[%s1282_s1 + $0x100] sm:$0xff] }
   0xd   :  { %600 = vmatpush1.bf16.msra.mxu0 %v599_v19  ;;  %v621_v51 = vpack.c.bf16 %v65_v49, %v63_v48  ;;  %v64_v53 = vld [vmem:[%s1282_s1 + $0x110] sm:$0xff]  ;;  %v67_v54 = vld [vmem:[%s1282_s1 + $0x128] sm:$0xff]  ;;  %v69_v55 = vld [vmem:[%s1282_s1 + $0x138] sm:$0xff] }
   0xe   :  { %602 = vmatprep.subr.bf16.mxu0 %v601_v20  ;;  %v66_v56 = vld [vmem:[%s1282_s1 + $0x120] sm:$0xff]  ;;  %v623_v57 = vpack.c.bf16 %v64_v53, %v62_v52  ;;  %v68_v58 = vld [vmem:[%s1282_s1 + $0x130] sm:$0xff]  ;;  %v71_v59 = vld [vmem:[%s1282_s1 + $0x148] sm:$0xff]  ;;  %v625_v61 = vpack.c.bf16 %v69_v55, %v67_v54 }
   0xf   :  { %v73_v60 = vld [vmem:[%s1282_s1 + $0x158] sm:$0xff]  ;;  %v298_v62 = vld [vmem:[%s1284_s3 + $0x80] sm:$0xff]  ;;  %v299_v63 = vld [vmem:[%s1284_s3 + $0x88] sm:$0xff]  ;;  %v627_v10 = vpack.c.bf16 %v68_v58, %v66_v56 }
  0x10   :  { %v282_v0 = vld [vmem:[%s1284_s3] sm:$0xff]  ;;  %v685_v1 = vpack.c.bf16 %v299_v63, %v298_v62  ;;  %v283_v2 = vld [vmem:[%s1284_s3 + $0x8] sm:$0xff]  ;;  %v300_v3 = vld [vmem:[%s1284_s3 + $0x90] sm:$0xff]  ;;  %v629_v12 = vpack.c.bf16 %v73_v60, %v71_v59 }
  0x11   :  { %604 = vmatpush1.bf16.msra.mxu0 %v603_v25  ;;  %v301_v4 = vld [vmem:[%s1284_s3 + $0x98] sm:$0xff]  ;;  %v687_v5 = vpack.c.bf16 %v283_v2, %v282_v0  ;;  %v284_v7 = vld [vmem:[%s1284_s3 + $0x10] sm:$0xff]  ;;  %v302_v9 = vld [vmem:[%s1284_s3 + $0xa0] sm:$0xff] }
  0x12   :  { %606 = vmatprep.subr.bf16.mxu0 %v605_v26  ;;  %v689_v6 = vpack.c.bf16 %v301_v4, %v300_v3  ;;  %v285_v8 = vld [vmem:[%s1284_s3 + $0x18] sm:$0xff]  ;;  %686 = vmatprep.subr.bf16.mxu1 %v685_v1  ;;  %v303_v11 = vld [vmem:[%s1284_s3 + $0xa8] sm:$0xff]  ;;  %v70_v13 = vld [vmem:[%s1282_s1 + $0x140] sm:$0xff] }
  0x13   :  { %v72_v14 = vld [vmem:[%s1282_s1 + $0x150] sm:$0xff]  ;;  %v75_v15 = vld [vmem:[%s1282_s1 + $0x168] sm:$0xff]  ;;  %688 = vmatpush3.bf16.msra.mxu1 %v687_v5  ;;  %v691_v16 = vpack.c.bf16 %v285_v8, %v284_v7  ;;  %v77_v17 = vld [vmem:[%s1282_s1 + $0x178] sm:$0xff]  ;;  %v693_v18 = vpack.c.bf16 %v303_v11, %v302_v9 }
  0x14   :  { %690 = vmatprep.subr.bf16.mxu1 %v689_v6  ;;  %v286_v19 = vld [vmem:[%s1284_s3 + $0x20] sm:$0xff]  ;;  %v287_v20 = vld [vmem:[%s1284_s3 + $0x28] sm:$0xff]  ;;  %v304_v21 = vld [vmem:[%s1284_s3 + $0xb0] sm:$0xff]  ;;  %v631_v23 = vpack.c.bf16 %v72_v14, %v70_v13  ;;  %v633_v25 = vpack.c.bf16 %v77_v17, %v75_v15 }
  0x15   :  { %608 = vmatpush1.bf16.msra.mxu0 %v607_v31  ;;  %v305_v22 = vld [vmem:[%s1284_s3 + $0xb8] sm:$0xff]  ;;  %v74_v24 = vld [vmem:[%s1282_s1 + $0x160] sm:$0xff]  ;;  %v76_v26 = vld [vmem:[%s1282_s1 + $0x170] sm:$0xff]  ;;  %v695_v29 = vpack.c.bf16 %v287_v20, %v286_v19 }
  0x16   :  { %610 = vmatprep.subr.bf16.mxu0 %v609_v32  ;;  %v79_v27 = vld [vmem:[%s1282_s1 + $0x188] sm:$0xff]  ;;  %v81_v28 = vld [vmem:[%s1282_s1 + $0x198] sm:$0xff]  ;;  %v697_v30 = vpack.c.bf16 %v305_v22, %v304_v21  ;;  %v288_v31 = vld [vmem:[%s1284_s3 + $0x30] sm:$0xff] }
  0x17   :  { %692 = vmatpush3.bf16.msra.mxu1 %v691_v16  ;;  %v289_v32 = vld [vmem:[%s1284_s3 + $0x38] sm:$0xff] }
  0x18   :  { %694 = vmatprep.subr.bf16.mxu1 %v693_v18 }
  0x19   :  { %612 = vmatpush1.bf16.msra.mxu0 %v611_v37 }
  0x1a   :  { %614 = vmatprep.subr.bf16.mxu0 %v613_v38 }
  0x1d   :  { %616 = vmatpush1.bf16.msra.mxu0 %v615_v44 }
  0x1e   :  { %618 = vmatprep.subr.bf16.mxu0 %v617_v45 }
  0x21   :  { %620 = vmatpush1.bf16.msra.mxu0 %v619_v50 }
  0x22   :  { %622 = vmatprep.subr.bf16.mxu0 %v621_v51 }
  0x25   :  { %624 = vmatpush1.bf16.msra.mxu0 %v623_v57 }
  0x26   :  { %626 = vmatprep.subr.bf16.mxu0 %v625_v61 }
  0x29   :  { %628 = vmatpush1.bf16.msra.mxu0 %v627_v10 }
  0x2a   :  { %630 = vmatprep.subr.bf16.mxu0 %v629_v12 }
  0x2b   :  { %12 = vsyncpa [#allocation3], 0  ;;  %v306_v33 = vld [vmem:[%s1284_s3 + $0xc0] sm:$0xff]  ;;  %v307_v34 = vld [vmem:[%s1284_s3 + $0xc8] sm:$0xff]  ;;  %v635_v35 = vpack.c.bf16 %v76_v26, %v74_v24  ;;  %v637_v36 = vpack.c.bf16 %v81_v28, %v79_v27  ;;  %696 = vmatpush3.bf16.msra.mxu1 %v695_v29  ;;  %v699_v40 = vpack.c.bf16 %v289_v32, %v288_v31  ;;  %vm775_vm0 = vmmov 0  }
  0x2c   :  { %v78_v37 = vld [vmem:[%s1282_s1 + $0x180] sm:$0xff]  ;;  %v80_v38 = vld [vmem:[%s1282_s1 + $0x190] sm:$0xff]  ;;  %v83_v39 = vld [vmem:[%s1282_s1 + $0x1a8] sm:$0xff]  ;;  %698 = vmatprep.subr.bf16.mxu1 %v697_v30  ;;  %v701_v42 = vpack.c.bf16 %v307_v34, %v306_v33 }
  0x2d   :  { %632 = vmatpush1.bf16.msra.mxu0 %v631_v23  ;;  %v85_v41 = vld [vmem:[%s1282_s1 + $0x1b8] sm:$0xff]  ;;  %v290_v43 = vld [vmem:[%s1284_s3 + $0x40] sm:$0xff]  ;;  %v291_v44 = vld [vmem:[%s1284_s3 + $0x48] sm:$0xff]  ;;  %v639_v47 = vpack.c.bf16 %v80_v38, %v78_v37  ;;  %v773_v23 = vmov 0.0  }
  0x2e   :  { %634 = vmatprep.subr.bf16.mxu0 %v633_v25  ;;  %v308_v45 = vld [vmem:[%s1284_s3 + $0xd0] sm:$0xff]  ;;  %v309_v46 = vld [vmem:[%s1284_s3 + $0xd8] sm:$0xff]  ;;  %v641_v48 = vpack.c.bf16 %v85_v41, %v83_v39  ;;  %v82_v49 = vld [vmem:[%s1282_s1 + $0x1a0] sm:$0xff]  ;;  %v703_v52 = vpack.c.bf16 %v291_v44, %v290_v43 }
  0x2f   :  { %v84_v50 = vld [vmem:[%s1282_s1 + $0x1b0] sm:$0xff]  ;;  %v87_v51 = vld [vmem:[%s1282_s1 + $0x1c8] sm:$0xff]  ;;  %700 = vmatpush3.bf16.msra.mxu1 %v699_v40  ;;  %v89_v53 = vld [vmem:[%s1282_s1 + $0x1d8] sm:$0xff]  ;;  %v705_v54 = vpack.c.bf16 %v309_v46, %v308_v45 }
  0x30   :  { %702 = vmatprep.subr.bf16.mxu1 %v701_v42  ;;  %v292_v55 = vld [vmem:[%s1284_s3 + $0x50] sm:$0xff]  ;;  %v293_v56 = vld [vmem:[%s1284_s3 + $0x58] sm:$0xff]  ;;  %v310_v57 = vld [vmem:[%s1284_s3 + $0xe0] sm:$0xff]  ;;  %v643_v59 = vpack.c.bf16 %v84_v50, %v82_v49  ;;  %v645_v60 = vpack.c.bf16 %v89_v53, %v87_v51 }
  0x31   :  { %636 = vmatpush1.bf16.msra.mxu0 %v635_v35  ;;  %v311_v58 = vld [vmem:[%s1284_s3 + $0xe8] sm:$0xff]  ;;  %v86_v61 = vld [vmem:[%s1282_s1 + $0x1c0] sm:$0xff]  ;;  %v88_v62 = vld [vmem:[%s1282_s1 + $0x1d0] sm:$0xff]  ;;  %v707_v63 = vpack.c.bf16 %v293_v56, %v292_v55 }
  0x32   :  { %638 = vmatprep.subr.bf16.mxu0 %v637_v36  ;;  %v91_v0 = vld [vmem:[%s1282_s1 + $0x1e8] sm:$0xff]  ;;  %v93_v1 = vld [vmem:[%s1282_s1 + $0x1f8] sm:$0xff]  ;;  %v709_v2 = vpack.c.bf16 %v311_v58, %v310_v57  ;;  %v647_v3 = vpack.c.bf16 %v88_v62, %v86_v61  ;;  %v90_v5 = vld [vmem:[%s1282_s1 + $0x1e0] sm:$0xff] }
  0x33   :  { %704 = vmatpush3.bf16.msra.mxu1 %v703_v52  ;;  %v649_v4 = vpack.c.bf16 %v93_v1, %v91_v0  ;;  %v92_v6 = vld [vmem:[%s1282_s1 + $0x1f0] sm:$0xff]  ;;  %v95_v7 = vld [vmem:[%s1282_s1 + $0x208] sm:$0xff]  ;;  %v97_v8 = vld [vmem:[%s1282_s1 + $0x218] sm:$0xff] }
  0x34   :  { %706 = vmatprep.subr.bf16.mxu1 %v705_v54  ;;  %v651_v9 = vpack.c.bf16 %v92_v6, %v90_v5  ;;  %v653_v10 = vpack.c.bf16 %v97_v8, %v95_v7  ;;  %v94_v11 = vld [vmem:[%s1282_s1 + $0x200] sm:$0xff]  ;;  %v96_v12 = vld [vmem:[%s1282_s1 + $0x210] sm:$0xff]  ;;  %v99_v13 = vld [vmem:[%s1282_s1 + $0x228] sm:$0xff]  ;;  %v128_v5 = vlaneseq }
  0x35   :  { %640 = vmatpush1.bf16.msra.mxu0 %v639_v47  ;;  %v101_v14 = vld [vmem:[%s1282_s1 + $0x238] sm:$0xff]  ;;  %v27_v15 = vld [vmem:[%s1281_s0] sm:$0xff]  ;;  %v655_v16 = vpack.c.bf16 %v96_v12, %v94_v11  ;;  %v100_v19 = vld [vmem:[%s1282_s1 + $0x230] sm:$0xff] }
  0x36   :  { %642 = vmatprep.subr.bf16.mxu0 %v641_v48  ;;  %v657_v17 = vpack.c.bf16 %v101_v14, %v99_v13  ;;  %v98_v18 = vld [vmem:[%s1282_s1 + $0x220] sm:$0xff]  ;;  %v103_v20 = vld [vmem:[%s1282_s1 + $0x248] sm:$0xff]  ;;  %v105_v21 = vld [vmem:[%s1282_s1 + $0x258] sm:$0xff]  ;;  %v129_v6 = vshrl.u32 %v128_v5, 7 }
  0x37   :  { %708 = vmatpush3.bf16.msra.mxu1 %v707_v63  ;;  %v659_v22 = vpack.c.bf16 %v100_v19, %v98_v18  ;;  %v661_v24 = vpack.c.bf16 %v105_v21, %v103_v20  ;;  %v102_v25 = vld [vmem:[%s1282_s1 + $0x240] sm:$0xff]  ;;  %v104_v26 = vld [vmem:[%s1282_s1 + $0x250] sm:$0xff]  ;;  %v107_v27 = vld [vmem:[%s1282_s1 + $0x268] sm:$0xff] }
  0x38   :  { %710 = vmatprep.subr.bf16.mxu1 %v709_v2  ;;  %v109_v28 = vld [vmem:[%s1282_s1 + $0x278] sm:$0xff]  ;;  %v663_v29 = vpack.c.bf16 %v104_v26, %v102_v25  ;;  %v106_v31 = vld [vmem:[%s1282_s1 + $0x260] sm:$0xff]  ;;  %v108_v32 = vld [vmem:[%s1282_s1 + $0x270] sm:$0xff]  ;;  %v130_v7 = vsub.s32 0, %v129_v6 }
  0x39   :  { %644 = vmatpush1.bf16.msra.mxu0 %v643_v59  ;;  %v665_v30 = vpack.c.bf16 %v109_v28, %v107_v27  ;;  %v111_v33 = vld [vmem:[%s1282_s1 + $0x288] sm:$0xff]  ;;  %v113_v34 = vld [vmem:[%s1282_s1 + $0x298] sm:$0xff]  ;;  %v667_v35 = vpack.c.bf16 %v108_v32, %v106_v31  ;;  %v110_v37 = vld [vmem:[%s1282_s1 + $0x280] sm:$0xff] }
  0x3a   :  { %646 = vmatprep.subr.bf16.mxu0 %v645_v60  ;;  %v669_v36 = vpack.c.bf16 %v113_v34, %v111_v33  ;;  %v112_v38 = vld [vmem:[%s1282_s1 + $0x290] sm:$0xff]  ;;  %v115_v39 = vld [vmem:[%s1282_s1 + $0x2a8] sm:$0xff]  ;;  %v117_v40 = vld [vmem:[%s1282_s1 + $0x2b8] sm:$0xff] }
  0x3b   :  { %v671_v41 = vpack.c.bf16 %v112_v38, %v110_v37  ;;  %v673_v42 = vpack.c.bf16 %v117_v40, %v115_v39  ;;  %v114_v43 = vld [vmem:[%s1282_s1 + $0x2a0] sm:$0xff]  ;;  %v116_v44 = vld [vmem:[%s1282_s1 + $0x2b0] sm:$0xff]  ;;  %v119_v45 = vld [vmem:[%s1282_s1 + $0x2c8] sm:$0xff] }
  0x3c   :  { %v121_v46 = vld [vmem:[%s1282_s1 + $0x2d8] sm:$0xff]  ;;  %v675_v47 = vpack.c.bf16 %v116_v44, %v114_v43  ;;  %v118_v49 = vld [vmem:[%s1282_s1 + $0x2c0] sm:$0xff]  ;;  %v120_v50 = vld [vmem:[%s1282_s1 + $0x2d0] sm:$0xff] }
  0x3d   :  { %648 = vmatpush1.bf16.msra.mxu0 %v647_v3  ;;  %v677_v48 = vpack.c.bf16 %v121_v46, %v119_v45  ;;  %v123_v51 = vld [vmem:[%s1282_s1 + $0x2e8] sm:$0xff]  ;;  %v125_v52 = vld [vmem:[%s1282_s1 + $0x2f8] sm:$0xff]  ;;  %v679_v53 = vpack.c.bf16 %v120_v50, %v118_v49  ;;  %v122_v55 = vld [vmem:[%s1282_s1 + $0x2e0] sm:$0xff] }
  0x3e   :  { %650 = vmatprep.subr.bf16.mxu0 %v649_v4  ;;  %v681_v54 = vpack.c.bf16 %v125_v52, %v123_v51  ;;  %v124_v56 = vld [vmem:[%s1282_s1 + $0x2f0] sm:$0xff]  ;;  %v294_v59 = vld [vmem:[%s1284_s3 + $0x60] sm:$0xff]  ;;  %v295_v60 = vld [vmem:[%s1284_s3 + $0x68] sm:$0xff]  ;;  %v774_v4 = vmov 0.0|0.0  }
  0x3f   :  { %v683_v57 = vpack.c.bf16 %v124_v56, %v122_v55  ;;  %v29_v58 = vld [vmem:[%s1281_s0 + $0x10] sm:$0xff]  ;;  %v711_v61 = vpack.c.bf16 %v295_v60, %v294_v59  ;;  %v313_v63 = vld [vmem:[%s1284_s3 + $0xf8] sm:$0xff]  ;;  %v126_v8 = vld [vmem:[%s1283_s2] sm:$0x3] }
  0x40   :  { %v312_v62 = vld [vmem:[%s1284_s3 + $0xf0] sm:$0xff]  ;;  %v297_v2 = vld [vmem:[%s1284_s3 + $0x78] sm:$0xff]  ;;  %v396_v25 = vld [vmem:[%s1286_s5 + $0x20] sm:$0xff] }
  0x41   :  { %652 = vmatpush1.bf16.msra.mxu0 %v651_v9  ;;  %712 = vmatpush3.bf16.msra.mxu1 %v711_v61  ;;  %v713_v0 = vpack.c.bf16 %v313_v63, %v312_v62  ;;  %v296_v1 = vld [vmem:[%s1284_s3 + $0x70] sm:$0xff]  ;;  %v134_v9 = vsub.s32 1, %v129_v6  ;;  %v397_v26 = vld [vmem:[%s1286_s5 + $0x28] sm:$0xff]  ;;  %v400_v31 = vld [vmem:[%s1286_s5 + $0x40] sm:$0xff] }
  0x42   :  { %654 = vmatprep.subr.bf16.mxu0 %v653_v10  ;;  %v715_v3 = vpack.c.bf16 %v297_v2, %v296_v1  ;;  %v131_v10 = vrot.slane %v126_v8, %v130_v7  ;;  %v394_v21 = vld [vmem:[%s1286_s5 + $0x10] sm:$0xff]  ;;  %v724_v27 = vpack.c.bf16 %v397_v26, %v396_v25  ;;  %v401_v32 = vld [vmem:[%s1286_s5 + $0x48] sm:$0xff]  ;;  %v404_v37 = vld [vmem:[%s1286_s5 + $0x60] sm:$0xff] }
  0x43   :  { %714 = vmatprep.subr.bf16.mxu1 %v713_v0  ;;  %v135_v11 = vrot.slane %v126_v8, %v134_v9  ;;  %v398_v28 = vld [vmem:[%s1286_s5 + $0x30] sm:$0xff]  ;;  %v730_v33 = vpack.c.bf16 %v401_v32, %v400_v31  ;;  %v405_v38 = vld [vmem:[%s1286_s5 + $0x68] sm:$0xff]  ;;  %v500_v44 = vld [vmem:[%s1285_s4] ss:$0 sm:$0xff] }
  0x44   :  { %203 = vmatmul.mubr.f32.vlgmr.msra.gmra.mrb[0].mxu0 %v27_v15  ;;  %v392_v15 = vld [vmem:[%s1286_s5] sm:$0xff]  ;;  %v402_v34 = vld [vmem:[%s1286_s5 + $0x50] sm:$0xff]  ;;  %v736_v39 = vpack.c.bf16 %v405_v38, %v404_v37 }
  0x45   :  { %656 = vmatpush1.bf16.msra.mxu0 %v655_v16  ;;  %273 = vmatprep.mubr.f32.mxu0 %v773_v23  ;;  %v393_v16 = vld [vmem:[%s1286_s5 + $0x8] sm:$0xff]  ;;  %v406_v40 = vld [vmem:[%s1286_s5 + $0x70] sm:$0xff]  ;;  %v501_v49 = vld [vmem:[%s1287_s6] ss:$0 sm:$0xff] }
  0x46   :  { %658 = vmatprep.subr.bf16.mxu0 %v657_v17  ;;  %716 = vmatpush3.bf16.msra.mxu1 %v715_v3  ;;  %v718_v19 = vpack.c.bf16 %v393_v16, %v392_v15 }
  0x47   :  { %717 = vmatprep.subr.bf16.mxu1 %v774_v4 }
  0x49   :  { %660 = vmatpush1.bf16.msra.mxu0 %v659_v22  ;;  %v395_v22 = vld [vmem:[%s1286_s5 + $0x18] sm:$0xff] }
  0x4a   :  { %662 = vmatprep.subr.bf16.mxu0 %v661_v24  ;;  %v721_v24 = vpack.c.bf16 %v395_v22, %v394_v21 }
  0x4d   :  { %664 = vmatpush1.bf16.msra.mxu0 %v663_v29  ;;  %v399_v29 = vld [vmem:[%s1286_s5 + $0x38] sm:$0xff] }
  0x4e   :  { %666 = vmatprep.subr.bf16.mxu0 %v665_v30  ;;  %v727_v30 = vpack.c.bf16 %v399_v29, %v398_v28 }
  0x51   :  { %668 = vmatpush1.bf16.msra.mxu0 %v667_v35  ;;  %v403_v35 = vld [vmem:[%s1286_s5 + $0x58] sm:$0xff] }
  0x52   :  { %670 = vmatprep.subr.bf16.mxu0 %v669_v36  ;;  %v733_v36 = vpack.c.bf16 %v403_v35, %v402_v34 }
  0x55   :  { %672 = vmatpush1.bf16.msra.mxu0 %v671_v41  ;;  %v407_v41 = vld [vmem:[%s1286_s5 + $0x78] sm:$0xff]  ;;  %s776_s5 = smov [#allocation2]  }
  0x56   :  { %674 = vmatprep.subr.bf16.mxu0 %v673_v42  ;;  %v739_v42 = vpack.c.bf16 %v407_v41, %v406_v40  ;;  %s492_s17 = sshll.u32 %s776_s5, 4  ;;  %s493_s17 = int_to_ptr.vmem [resolvable:$true] %s492_s17 }
  0x57   :  { %s749_s18 = scalar_lea.vmem %s493_s17, 128  ;;  %p754_p1 = scmp.lt.s32.totalorder %s493_s17, %s493_s17 }
  0x58   :  { %p750_p0 = scmp.ne.s32.totalorder %s493_s17, %s749_s18  ;;  %p755_p2 = scmp.lt.s32.totalorder %s749_s18, %s749_s18 }
  0x59   :  { %676 = vmatpush1.bf16.msra.mxu0 %v675_v47 }
  0x5a   :  { %678 = vmatprep.subr.bf16.mxu0 %v677_v48  ;;  %p756_p3 = por %p755_p2, %p754_p1 }
  0x5c   :  { %p757_p4 = pnand %p756_p3, %p750_p0 }
  0x5d   :  { %680 = vmatpush1.bf16.msra.mxu0 %v679_v53 }
  0x5e   :  { %682 = vmatprep.subr.bf16.mxu0 %v681_v54 }
  0x61   :  { %684 = vmatpush1.bf16.msra.mxu0 %v683_v57 }
  0x64   :  { %274 = vmatmul.mubr.f32.vlgmr.msra.gmra.mrb[0].mxu0 %v29_v58 }
 0x137   :  { %v275_v12 = vpop.f32.mrb[0].mxu0 }
 0x138   :  { %v741_v13 = vadd.f32 %v275_v12, %v131_v10  ;;  %v277_v14 = vpop.f32.mrb[1].mxu0 }
 0x139   :  { %v742_v17 = vadd.f32 %v277_v14, %v135_v11 }
 0x13a   :  { %v280_v20 = vmax.f32 %v741_v13, 0.0 }
 0x13b   :  { %v281_v18 = vmax.f32 %v742_v17, 0.0 }
 0x13d   :  { %385 = vmatprep.mubr.f32.mxu1 %v281_v18 }
 0x13e   :  { %386 = vmatmul.mubr.f32.vlgmr.msra.gmra.mrb[0].mxu1 %v280_v20 }
 0x13f   :  { %719 = vmatpush3.bf16.msra.mxu1 %v718_v19  ;;  %586 = vmatprep.mubr.msk.f32.mxu1 %vm775_vm0, %v773_v23 }
 0x140   :  { %720 = vmatprep.subr.bf16.mxu1 %v774_v4 }
 0x143   :  { %722 = vmatpush3.bf16.msra.mxu1 %v721_v24 }
 0x144   :  { %723 = vmatprep.subr.bf16.mxu1 %v774_v4 }
 0x147   :  { %725 = vmatpush3.bf16.msra.mxu1 %v724_v27 }
 0x148   :  { %726 = vmatprep.subr.bf16.mxu1 %v774_v4 }
 0x14b   :  { %728 = vmatpush3.bf16.msra.mxu1 %v727_v30 }
 0x14c   :  { %729 = vmatprep.subr.bf16.mxu1 %v774_v4 }
 0x14f   :  { %731 = vmatpush3.bf16.msra.mxu1 %v730_v33 }
 0x150   :  { %732 = vmatprep.subr.bf16.mxu1 %v774_v4 }
 0x153   :  { %734 = vmatpush3.bf16.msra.mxu1 %v733_v36 }
 0x154   :  { %735 = vmatprep.subr.bf16.mxu1 %v774_v4 }
 0x157   :  { %737 = vmatpush3.bf16.msra.mxu1 %v736_v39 }
 0x158   :  { %738 = vmatprep.subr.bf16.mxu1 %v774_v4 }
 0x15b   :  { %740 = vmatpush3.bf16.msra.mxu1 %v739_v42 }
 0x211   :  { %v534_v43 = vpop.f32.mrb[0].mxu1 }
 0x212   :  { %v535_v45 = vpop.f32.mrb[1].mxu1 }
 0x213   :  { %v536_v46 = vadd.f32 %v535_v45, %v534_v43 }
 0x215   :  { %v388_v47 = vadd.f32 %v536_v46, %v500_v44 }
 0x217   :  { %v391_v48 = vmax.f32 %v388_v47, 0.0 }
 0x219   :  { %587 = vmatmul.mubr.f32.vlgmr.msra.gmra.mrb[2].mxu1 %v391_v48 }
 0x2ec   :  { %v481_v50 = vpop.f32.mrb[2].mxu1 }
 0x2ed   :  { %v482_v51 = vadd.f32 %v501_v49, %v481_v50  ;;  %v588_v52 = vpop.f32.mrb[3].mxu1 }
 0x2ef   :  { %485 = vst [vmem:[#allocation2] sm:$0xff] %v482_v51 }
 0x2f0   :  { %760 = shalt.err (!%p757_p4)
}
 0x2f1   :  { %s761_s20 = scalar_lea.hbm %s1288_s7, 128 }
 0x2f2   :  { %p762_p5 = scmp.ne.s32.totalorder %s1288_s7, %s761_s20  ;;  %p765_p6 = scmp.lt.u32.totalorder %s761_s20, %s1288_s7 }
 0x2f4   :  { %p767_p7 = pnand %p765_p6, %p762_p5 }
 0x2f6   :  { %770 = shalt.err (!%p767_p7)
}
 0x2f7   :  { %495 = dma.vmem_to_hbm [thread:$0]  %s493_s17, 128, %s1288_s7, [#allocation3]  }
 0x2f8   :  { %771 = dma.done.wait [#allocation3], 128  }
 0x2f9   :  { %772 = vsyncadd [#allocation3], 4294967168 }
 0x2fa   :  { %499 = vsyncpa [#allocation3], 1 }

</bundles_post_ra>
